<compile_context>
chip_gen: v5e
topology: v5e:2x2
jax: 0.10.0
libtpu: 0.0.40
codegen_flags: <defaults>
</compile_context>

<pallas_src>
import jax
import jax.numpy as jnp
from jax.experimental import pallas as pl
from jax.experimental.pallas import tpu as pltpu

# Prefer a wide, lane-dense slab when the flat size allows a zero-copy reshape.
_WIDE_CANDIDATES = (1024, 512, 256, 128)

# Target f32 bytes per input block (~4 MiB).  Double-buffered f32 in + u8 out
# stays ~10 MiB, comfortably under the 32 MiB scoped-VMEM limit requested
# below on every generation (v5e default is only 16 MiB, so raise explicitly).
_DEFAULT_BLOCK_BYTES = 4 * 1024 * 1024
_VMEM_LIMIT_BYTES = 32 * 1024 * 1024

# Below this element count, one fused plain-JAX pass beats pallas_call fixed
# cost plus wrapper op overhead (single face image ~ hundreds of KB).
_PALLAS_MIN_ELEMS = 1 << 19  # 512K elements == 2 MiB of f32


def _to_bytes_kernel(x_ref, o_ref):
    """x_ref: (tile_rows, width) f32 in VMEM, values expected in [0, 1].
       o_ref: (tile_rows, width) u8  -> ToPILImage byte values (x*255, clamped).
    """
    o_ref[...] = jnp.clip(x_ref[...] * 255.0, 0.0, 255.0).astype(jnp.uint8)
    # TODO(synk): JPEG encode + base64 + HTTP POST to the remote face API have
    # no Pallas / on-device equivalent; the offline error branch ([[0.5, 0.5]])
    # is reproduced in the wrapper.


def _pick_slab(img_chw):
    """Zero-copy 2-D view of the CHW f32 image for the kernel (no transpose,
    no pad, no slice — only contiguous reshapes)."""
    c, h, w = img_chw.shape
    n = c * h * w
    for wide in _WIDE_CANDIDATES:
        if n % wide == 0:
            return img_chw.reshape(n // wide, wide)  # lane-dense slab
    # Fall back to the natural (C*H, W) layout; last dim equals the full array
    # dim so the BlockSpec is always legal even if W is not a multiple of 128.
    return img_chw.reshape(c * h, w)


def _pick_tile_rows(total_rows, width, block_bytes):
    """Rows per block: multiple of 32 (u8 packing), ~block_bytes of f32,
    or the full row extent when the slab is smaller than one block."""
    row_bytes = width * 4  # the f32 input dominates block VMEM use
    r = max(32, block_bytes // row_bytes)
    r = max(32, (r // 32) * 32)
    if r >= total_rows:
        return total_rows  # single block spanning the full dim (always legal)
    return r


def _bytes_pallas(x2d, block_bytes):
    rows, width = x2d.shape
    tile_rows = _pick_tile_rows(rows, width, block_bytes)
    grid = (pl.cdiv(rows, tile_rows),)
    return pl.pallas_call(
        _to_bytes_kernel,
        out_shape=jax.ShapeDtypeStruct((rows, width), jnp.uint8),
        grid_spec=pltpu.PrefetchScalarGridSpec(
            num_scalar_prefetch=0,
            grid=grid,
            in_specs=[pl.BlockSpec((tile_rows, width), lambda i: (i, 0))],
            out_specs=pl.BlockSpec((tile_rows, width), lambda i: (i, 0)),
        ),
        compiler_params=pltpu.CompilerParams(
            # Memory-bound streaming kernel; row-block axis is independent.
            # (v7x note: CORE_PARALLEL could split DMA issue across the 2 TCs,
            # but HBM bandwidth is shared, so benefit is bounded — keep simple.)
            dimension_semantics=("parallel",),
            vmem_limit_bytes=_VMEM_LIMIT_BYTES,
        ),
    )(x2d)


def face_forward(image, logits_score=0.5, *, min_pallas_elems=_PALLAS_MIN_ELEMS,
                 block_bytes=_DEFAULT_BLOCK_BYTES):
    """image: (1, C, H, W) float32 NCHW in [0, 1].

    Returns (a, byte_hwc):
      a        : (1, 2) f32  == [[logits_score, 1 - logits_score]]
                 (offline / error branch of the original module).
      byte_hwc : (H, W, C) uint8 — the ToPILImage byte image (the only real
                 on-device tensor work in the module's forward).
    """
    img = jnp.squeeze(image, axis=0).astype(jnp.float32)  # squeeze(0) -> (C, H, W)
    c, h, w = img.shape
    n = c * h * w

    if n < min_pallas_elems:
        # Small-image fast path: XLA fuses mul/clip/cast into the transpose
        # copy — one ~5 B/px pass, no custom-call fixed cost.
        byte_chw = jnp.clip(img * 255.0, 0.0, 255.0).astype(jnp.uint8)
    else:
        x2d = _pick_slab(img)                     # contiguous reshape, no copy
        byte_chw = _bytes_pallas(x2d, block_bytes).reshape(c, h, w)

    # CHW -> HWC done on uint8 AFTER the kernel (1+1 B/px instead of 4+4 B/px).
    byte_hwc = jnp.transpose(byte_chw, (1, 2, 0))

    # Output head: depends only on a host-side scalar (offline error branch
    # gives 0.5), so it is plain JAX — no kernel work needed.
    p = jnp.float32(logits_score)
    a = jnp.stack([p, jnp.float32(1.0) - p]).reshape(1, 2)
    return a, byte_hwc


if __name__ == "__main__":
    key = jax.random.PRNGKey(0)
    k1, k2 = jax.random.split(key)

    def ref_bytes_hwc(image):
        chw = jnp.squeeze(image, axis=0)
        by = jnp.clip(chw * 255.0, 0.0, 255.0).astype(jnp.uint8)
        return jnp.transpose(by, (1, 2, 0))

    expected_a = jnp.array([[0.5, 0.5]], dtype=jnp.float32)

    # 1) Small NCHW image (module's realistic single-image forward) ->
    #    plain-JAX fast path.
    img_small = jax.random.uniform(k1, (1, 3, 16, 16), dtype=jnp.float32)
    a, b_small = face_forward(img_small)  # offline => error branch => [[0.5, 0.5]]
    a = jax.block_until_ready(a)
    b_small = jax.block_until_ready(b_small)
    assert a.shape == (1, 2) and a.dtype == jnp.float32
    assert jnp.allclose(a, expected_a)
    assert b_small.shape == (16, 16, 3) and b_small.dtype == jnp.uint8
    assert jnp.array_equal(b_small, ref_bytes_hwc(img_small))

    # 2) Force the Pallas path on a small-but-tileable image: 3x256x128 pixels
    #    -> zero-copy (96, 1024) lane-dense slab, 3 full (32, 1024) blocks.
    img_med = jax.random.uniform(k2, (1, 3, 256, 128), dtype=jnp.float32)
    a2, b_med = face_forward(img_med, min_pallas_elems=0,
                             block_bytes=32 * 1024 * 4)  # force 32-row blocks
    a2 = jax.block_until_ready(a2)
    b_med = jax.block_until_ready(b_med)
    assert jnp.allclose(a2, expected_a)
    assert b_med.shape == (256, 128, 3) and b_med.dtype == jnp.uint8
    assert jnp.array_equal(b_med, ref_bytes_hwc(img_med))

    # 3) Same image through the default block sizing (single (96, 1024) block).
    _, b_med2 = face_forward(img_med, min_pallas_elems=0)
    b_med2 = jax.block_until_ready(b_med2)
    assert jnp.array_equal(b_med2, ref_bytes_hwc(img_med))

    print("KERNEL_OK")
</pallas_src>

<mosaic_0001>
module attributes {stable_mosaic.version = 11 : i64} {
  func.func @_to_bytes_kernel(%arg0: i32, %arg1: memref<32x1024xf32, #tpu.memory_space<vmem>>, %arg2: memref<32x1024xi8, #tpu.memory_space<vmem>>) attributes {dimension_semantics = [#tpu.dimension_semantics<parallel>], iteration_bounds = array<i64: 3>, scalar_prefetch = 0 : i64, scratch_operands = 0 : i64, tpu.core_type = #tpu.core_type<tc>, window_params = [{transform_indices = @transform_0, window_bounds = array<i64: 32, 1024>}, {transform_indices = @transform_1, window_bounds = array<i64: 32, 1024>}]} {
    %c0 = arith.constant 0 : index
    %c0_0 = arith.constant 0 : index
    %0 = vector.load %arg1[%c0, %c0_0] : memref<32x1024xf32, #tpu.memory_space<vmem>>, vector<32x1024xf32>
    %cst = arith.constant 2.550000e+02 : f32
    %1 = vector.broadcast %cst : f32 to vector<32x1024xf32>
    %2 = arith.mulf %0, %1 : vector<32x1024xf32>
    %cst_1 = arith.constant 0.000000e+00 : f32
    %cst_2 = arith.constant 2.550000e+02 : f32
    %3 = vector.broadcast %cst_1 : f32 to vector<32x1024xf32>
    %4 = arith.maximumf %3, %2 : vector<32x1024xf32>
    %5 = vector.broadcast %cst_2 : f32 to vector<32x1024xf32>
    %6 = arith.minimumf %5, %4 : vector<32x1024xf32>
    %7 = arith.fptoui %6 : vector<32x1024xf32> to vector<32x1024xi8>
    %c0_3 = arith.constant 0 : index
    %c0_4 = arith.constant 0 : index
    %8 = vector.load %arg2[%c0_3, %c0_4] : memref<32x1024xi8, #tpu.memory_space<vmem>>, vector<32x1024xi8>
    tpu.vector_store %arg2[%c0_3, %c0_4], %7 {strides = array<i32>} : memref<32x1024xi8, #tpu.memory_space<vmem>>, vector<32x1024xi8>,
    return
  }
  func.func @transform_0(%arg0: i32) -> (i32, i32) {
    %c0_i32 = arith.constant 0 : i32
    %c0_i32_0 = arith.constant 0 : i32
    return %arg0, %c0_i32 : i32, i32
  }
  func.func @transform_1(%arg0: i32) -> (i32, i32) {
    %c0_i32 = arith.constant 0 : i32
    %c0_i32_0 = arith.constant 0 : i32
    return %arg0, %c0_i32 : i32, i32
  }
}

</mosaic_0001>

<bundles_post_ra>
// kernel: tpu_custom_call.1
= control target key start
LH: loop header
LB: loop body
LE: loop exit
PB: predicated region body
PF: predicated region fallthrough
CT: control target
= control target key end

     0   :  { %6 = vsyncpa [#allocation3], 0  ;;  %s1025_s0 = inlined_call_operand.hbm [shape: f32[96,1024], index: 0, kind: input, shape index: {}]   ;;  %s1026_s1 = inlined_call_operand.hbm [shape: u8[96,1024], index: 1, kind: output, shape index: {}]  }
   0x1   :  { %8 = vsyncpa [#allocation3 + $0x1], 0 }
   0x2   :  { %9 = vsyncpa [#allocation4], 0 }
   0x3   :  { %11 = vsyncpa [#allocation4 + $0x1], 0  ;;  %s850_s6 = smov 0   ;;  %s852_s7 = smov 0  }
   0x4   :  { %s854_s8 = smov 0   ;;  %s856_s9 = smov 0  }
   0x5 LB: > { %s871_s10 = sadd.s32 4294967295, %s836_s9   ;;  %s482_s11 = sadd.s32 4294967294, %s836_s9   ;;  %s836_s9 = sphi %s856_s9, %s1035_s9   ;;  %s832_s8 = sphi %s854_s8, %s1034_s8   ;;  %s828_s7 = sphi %s852_s7, %s1033_s7   ;;  %s824_s6 = sphi %s850_s6, %s1032_s6  }
   0x6   : > { %s875_s12 = sadd.s32 1, %s836_s9   ;;  %s24_s13 = sadd.s32 1, %s832_s8 }
   0x7   : > { %s21_s14 = ssub.s32 %s836_s9, %s875_s12  ;;  %p31_p0 = scmp.ne.s32.totalorder %s832_s8, %s828_s7 }
   0x8   : > { %p22_p1 = scmp.eq.s32.totalorder %s21_s14, 0  ;;  %p32_p2 = scmp.eq.s32.totalorder %s836_s9, 0 }
   0x9   : > { %p37_p3 = scmp.ne.s32.totalorder %s828_s7, %s824_s6  ;;  %p38_p4 = scmp.eq.s32.totalorder %s871_s10, 0 }
   0xa   : > { %s887_s15 = scalar_select %p22_p1, %s832_s8, %s24_s13  }
   0xb   : > { %p889_p5 = por %p32_p2, %p31_p0  ;;  %p893_p6 = por %p38_p4, %p37_p3 }
   0xc   : > { %p61_p7 = scmp.eq.s32.totalorder %s871_s10, 2  ;;  %p67_p8 = scmp.eq.s32.totalorder %s482_s11, 2 }
   0xd   : > { %p704_p9 = scmp.lt.s32.totalorder %s836_s9, 3  ;;  %s87_s20 = sand.u32 1, %s832_s8  }
   0xe   : > { %p899_p10 = por %p61_p7, %p31_p0  ;;  %p903_p11 = por %p67_p8, %p37_p3 }
   0xf   : > { %s530_s21 = sshll.u32 %s836_s9, 8  ;;  %s485_s22 = sshll.u32 %s87_s20, 8 }
  0x10   : > { %s97_s25 = scalar_lea.hbm %s1025_s0, %s530_s21  ;;  %s91_s27 = scalar_lea.vmem [#allocation2], %s485_s22 }
  0x11   : > { %s98_s26 = sshll.u32 %s97_s25, 4  ;;  %s100_s28 = sshll.u32 %s91_s27, 4  ;;  %s99_s26 = int_to_ptr.hbm [resolvable:$true] %s98_s26  ;;  %s101_s28 = int_to_ptr.vmem [resolvable:$true] %s100_s28 }
  0x12   : > { %p914_p12 = pnand %p704_p9, %p889_p5  ;;  %p489_p13 = scmp.ge.s32.totalorder %s836_s9, 1 }
  0x13   : > { %p108_p0 = scmp.lt.s32.totalorder %s836_s9, 4  ;;  %s88_s30 = scalar_lea.sflag [#allocation3], %s87_s20 }
  0x14   : > { %s740_s2 = sshra.s32 %s99_s26, 4  ;;  %p744_p2 = pneg %p914_p12  ;;  %s741_s2 = int_to_ptr.hbm [resolvable:$true] %s740_s2 }
  0x15   : > { %s742_s3 = scalar_lea.hbm %s741_s2, 256  ;;  %s747_s11 = scalar_lea.hbm %s1025_s0, 768 }
  0x16   : > { %p743_p1 = scmp.ne.s32.totalorder %s741_s2, %s742_s3  ;;  %p748_p5 = scmp.lt.s32.totalorder %s741_s2, %s1025_s0 }
  0x17   : > { %p749_p7 = scmp.lt.s32.totalorder %s747_s11, %s742_s3 }
  0x18   : > { %p745_p3 = pnand %p744_p2, %p743_p1 }
  0x19   : > { %p750_p8 = por %p749_p7, %p748_p5 }
  0x1a   : > { %p746_p4 = pneg %p745_p3 }
  0x1c   : > { %p751_p9 = pnand %p750_p8, %p746_p4 }
  0x1e   : > { %754 = shalt.err (!%p751_p9)
}
  0x1f   : > { %s838_s16 = smov 1024   ;;  %s839_s20 = smov 64  }
  0x20   : > { %699 = dma.hbm_to_vmem [thread:$0]  (!%p914_p12), %s99_s26, 4096, %s101_s28, %s88_s30, %s838_s16, %s838_s16, %s839_s20  }
  0x21   : > { %p109_p1 = pnand %p489_p13, %p108_p0 }
  0x22   : > { %s935_s21 = sand.u32 (!%p109_p1), 1, %s828_s7  }
  0x23   : > { %112 = sbr.rel (%p109_p1) target bundleno = 114 (0x72), region = 24  ;;  %s490_s22 = sshll.u32 (!%p109_p1), %s935_s21, 8 }
  0x24   : > { %s115_s23 = scalar_lea.sflag (!%p109_p1), [#allocation3], %s935_s21  ;;  %s939_s24 = scalar_lea.vmem (!%p109_p1), [#allocation2], %s490_s22 }
  0x28   : > { %815 = dma.done.wait (%p893_p6), %s115_s23, 4096  }
  0x29   : > { %817 = vsyncadd (%p893_p6), %s115_s23, 4294963200  ;;  %v139_v0 = vld [vmem:[%s939_s24] sm:$0xff]  ;;  %v140_v7 = vld [vmem:[%s939_s24 + $0x8] sm:$0xff]  ;;  %s491_s17 = sshll.u32 %s935_s21, 6  ;;  %s531_s26 = sshll.u32 %s871_s10, 6 }
  0x2a   : > { %v147_v1 = vld [vmem:[%s939_s24 + $0x40] sm:$0xff]  ;;  %v171_v4 = vmul.f32 255.0, %v139_v0  ;;  %v148_v8 = vld [vmem:[%s939_s24 + $0x48] sm:$0xff]  ;;  %v172_v12 = vmul.f32 255.0, %v140_v7  ;;  %v141_v44 = vld [vmem:[%s939_s24 + $0x10] sm:$0xff]  ;;  %s962_s25 = scalar_lea.vmem [#allocation5], %s491_s17  ;;  %s407_s29 = scalar_lea.hbm %s1026_s1, %s531_s26 }
  0x2b   : > { %v155_v2 = vld [vmem:[%s939_s24 + $0x80] sm:$0xff]  ;;  %v179_v5 = vmul.f32 255.0, %v147_v1  ;;  %v156_v10 = vld [vmem:[%s939_s24 + $0x88] sm:$0xff]  ;;  %v180_v13 = vmul.f32 255.0, %v148_v8  ;;  %v149_v48 = vld [vmem:[%s939_s24 + $0x50] sm:$0xff]  ;;  %v173_v57 = vmul.f32 255.0, %v141_v44 }
  0x2c   : > { %v163_v3 = vld [vmem:[%s939_s24 + $0xc0] sm:$0xff]  ;;  %v187_v6 = vmul.f32 255.0, %v155_v2  ;;  %v164_v11 = vld [vmem:[%s939_s24 + $0xc8] sm:$0xff]  ;;  %v492_v14 = vclamp-gez-f32 %v171_v4, 255.0  ;;  %v188_v17 = vmul.f32 255.0, %v156_v10  ;;  %v493_v20 = vclamp-gez-f32 %v172_v12, 255.0 }
  0x2d   : > { %v195_v9 = vmul.f32 255.0, %v163_v3  ;;  %v500_v15 = vclamp-gez-f32 %v179_v5, 255.0  ;;  %v196_v19 = vmul.f32 255.0, %v164_v11  ;;  %v501_v21 = vclamp-gez-f32 %v180_v13, 255.0  ;;  %v157_v52 = vld [vmem:[%s939_s24 + $0x90] sm:$0xff]  ;;  %v142_v62 = vld [vmem:[%s939_s24 + $0x18] sm:$0xff] }
  0x2e   : > { %v508_v16 = vclamp-gez-f32 %v187_v6, 255.0  ;;  %vm532_vm0 = vcmp.lt.s32.totalorder %v492_v14, 0  ;;  %v533_v22 = vceil.f32 %v492_v14  ;;  %v534_v23 = vfloor.f32 %v492_v14  ;;  %v165_v53 = vld [vmem:[%s939_s24 + $0xd0] sm:$0xff]  ;;  %v150_v63 = vld [vmem:[%s939_s24 + $0x58] sm:$0xff]  ;;  %s409_s10 = sshll.u32 %s962_s25, 4  ;;  %s411_s30 = sshll.u32 %s407_s29, 4  ;;  %s410_s10 = int_to_ptr.vmem [resolvable:$true] %s409_s10  ;;  %s412_s30 = int_to_ptr.hbm [resolvable:$true] %s411_s30 }
  0x2f   : > { %v516_v18 = vclamp-gez-f32 %v195_v9, 255.0  ;;  %vm572_vm1 = vcmp.lt.s32.totalorder %v500_v15, 0  ;;  %v573_v24 = vceil.f32 %v500_v15  ;;  %v574_v25 = vfloor.f32 %v500_v15  ;;  %s396_s2 = scalar_lea.sflag [#allocation4], %s935_s21  ;;  %s784_s3 = sshra.s32 %s412_s30, 4  ;;  %s785_s3 = int_to_ptr.hbm [resolvable:$true] %s784_s3 }
  0x30   : > { %vm612_vm2 = vcmp.lt.s32.totalorder %v508_v16, 0  ;;  %v613_v26 = vceil.f32 %v508_v16  ;;  %v535_v27 = vsel %vm532_vm0, %v533_v22, %v534_v23  ;;  %v614_v28 = vfloor.f32 %v508_v16  ;;  %v166_v22 = vld [vmem:[%s939_s24 + $0xd8] sm:$0xff]  ;;  %s786_s4 = scalar_lea.hbm %s785_s3, 64  ;;  %s790_s13 = scalar_lea.hbm %s1026_s1, 192 }
  0x31   : > { %vm652_vm3 = vcmp.lt.s32.totalorder %v516_v18, 0  ;;  %v653_v29 = vceil.f32 %v516_v18  ;;  %v536_v30 = vcvt.f32.s32 %v535_v27  ;;  %v575_v31 = vsel %vm572_vm1, %v573_v24, %v574_v25  ;;  %p787_p6 = scmp.ne.s32.totalorder %s785_s3, %s786_s4  ;;  %p791_p0 = scmp.lt.s32.totalorder %s785_s3, %s1026_s1 }
  0x32   : > { %v654_v32 = vfloor.f32 %v516_v18  ;;  %v509_v33 = vclamp-gez-f32 %v188_v17, 255.0  ;;  %v576_v34 = vcvt.f32.s32 %v575_v31  ;;  %v615_v35 = vsel %vm612_vm2, %v613_v26, %v614_v28  ;;  %v158_v17 = vld [vmem:[%s939_s24 + $0x98] sm:$0xff]  ;;  %v143_v26 = vld [vmem:[%s939_s24 + $0x20] sm:$0xff]  ;;  %p792_p2 = scmp.lt.s32.totalorder %s790_s13, %s786_s4 }
  0x33   : > { %v517_v36 = vclamp-gez-f32 %v196_v19, 255.0  ;;  %vm537_vm4 = vcmp.lt.s32.totalorder %v493_v20, 0  ;;  %v616_v37 = vcvt.f32.s32 %v615_v35  ;;  %v538_v39 = vceil.f32 %v493_v20  ;;  %p788_p12 = pnand %p787_p6, %p899_p10 }
  0x34   : > { %v655_v38 = vsel %vm652_vm3, %v653_v29, %v654_v32  ;;  %v539_v40 = vfloor.f32 %v493_v20  ;;  %v363_v42 = vpack.c.b16 %v576_v34, %v536_v30  ;;  %vm577_vm5 = vcmp.lt.s32.totalorder %v501_v21, 0  ;;  %p793_p3 = por %p792_p2, %p791_p0 }
  0x35   : > { %v656_v41 = vcvt.f32.s32 %v655_v38  ;;  %v578_v43 = vceil.f32 %v501_v21  ;;  %v579_v46 = vfloor.f32 %v501_v21  ;;  %vm617_vm6 = vcmp.lt.s32.totalorder %v509_v33, 0  ;;  %p789_p13 = pneg %p788_p12 }
  0x36   : > { %v540_v45 = vsel %vm537_vm4, %v538_v39, %v539_v40  ;;  %v618_v47 = vceil.f32 %v509_v33  ;;  %v619_v51 = vfloor.f32 %v509_v33  ;;  %vm657_vm7 = vcmp.lt.s32.totalorder %v517_v36, 0 }
  0x37   : > { %v364_v49 = vpack.c.b16 %v656_v41, %v616_v37  ;;  %v541_v50 = vcvt.f32.s32 %v540_v45  ;;  %v580_v54 = vsel %vm577_vm5, %v578_v43, %v579_v46  ;;  %v658_v55 = vceil.f32 %v517_v36  ;;  %p794_p4 = pnand %p793_p3, %p789_p13 }
  0x38   : > { %v659_v56 = vfloor.f32 %v517_v36  ;;  %v581_v59 = vcvt.f32.s32 %v580_v54  ;;  %v620_v60 = vsel %vm617_vm6, %v618_v47, %v619_v51  ;;  %v181_v61 = vmul.f32 255.0, %v149_v48  ;;  %v151_v48 = vld [vmem:[%s939_s24 + $0x60] sm:$0xff]  ;;  %v144_v54 = vld [vmem:[%s939_s24 + $0x28] sm:$0xff] }
  0x39   : > { %v365_v58 = vpack.c.b8 %v364_v49, %v363_v42  ;;  %v621_v0 = vcvt.f32.s32 %v620_v60  ;;  %v189_v2 = vmul.f32 255.0, %v157_v52  ;;  %v197_v3 = vmul.f32 255.0, %v165_v53  ;;  %v159_v49 = vld [vmem:[%s939_s24 + $0xa0] sm:$0xff] }
  0x3a   : > { %v660_v1 = vsel %vm657_vm7, %v658_v55, %v659_v56  ;;  %v366_v5 = vpack.c.b16 %v581_v59, %v541_v50  ;;  %v494_v6 = vclamp-gez-f32 %v173_v57, 255.0  ;;  %v502_v7 = vclamp-gez-f32 %v181_v61, 255.0  ;;  %v167_v53 = vld [vmem:[%s939_s24 + $0xe0] sm:$0xff]  ;;  %v152_v59 = vld [vmem:[%s939_s24 + $0x68] sm:$0xff] }
  0x3b   : > { %387 = vst [vmem:[%s962_s25] sm:$0xff] %v365_v58  ;;  %v661_v4 = vcvt.f32.s32 %v660_v1  ;;  %v510_v8 = vclamp-gez-f32 %v189_v2, 255.0  ;;  %v518_v9 = vclamp-gez-f32 %v197_v3, 255.0  ;;  %v174_v10 = vmul.f32 255.0, %v142_v62 }
  0x3c   : > { %v182_v11 = vmul.f32 255.0, %v150_v63  ;;  %vm542_vm8 = vcmp.lt.s32.totalorder %v494_v6, 0  ;;  %v543_v13 = vceil.f32 %v494_v6  ;;  %v544_v14 = vfloor.f32 %v494_v6 }
  0x3d   : > { %v367_v12 = vpack.c.b16 %v661_v4, %v621_v0  ;;  %vm582_vm9 = vcmp.lt.s32.totalorder %v502_v7, 0  ;;  %v583_v15 = vceil.f32 %v502_v7  ;;  %v584_v16 = vfloor.f32 %v502_v7 }
  0x3e   : > { %vm622_vm10 = vcmp.lt.s32.totalorder %v510_v8, 0  ;;  %v545_v19 = vsel %vm542_vm8, %v543_v13, %v544_v14  ;;  %v623_v20 = vceil.f32 %v510_v8  ;;  %v624_v21 = vfloor.f32 %v510_v8 }
  0x3f   : > { %v368_v18 = vpack.c.b8 %v367_v12, %v366_v5  ;;  %v546_v23 = vcvt.f32.s32 %v545_v19  ;;  %v585_v24 = vsel %vm582_vm9, %v583_v15, %v584_v16  ;;  %vm662_vm11 = vcmp.lt.s32.totalorder %v518_v9, 0 }
  0x40   : > { %v663_v25 = vceil.f32 %v518_v9  ;;  %v586_v27 = vcvt.f32.s32 %v585_v24  ;;  %v625_v28 = vsel %vm622_vm10, %v623_v20, %v624_v21  ;;  %v664_v29 = vfloor.f32 %v518_v9 }
  0x41   : > { %388 = vst [vmem:[%s962_s25 + $0x8] sm:$0xff] %v368_v18  ;;  %v190_v30 = vmul.f32 255.0, %v158_v17  ;;  %v626_v31 = vcvt.f32.s32 %v625_v28  ;;  %v198_v32 = vmul.f32 255.0, %v166_v22  ;;  %v495_v33 = vclamp-gez-f32 %v174_v10, 255.0  ;;  %v160_v17 = vld [vmem:[%s939_s24 + $0xa8] sm:$0xff]  ;;  %v145_v22 = vld [vmem:[%s939_s24 + $0x30] sm:$0xff] }
  0x42   : > { %v503_v34 = vclamp-gez-f32 %v182_v11, 255.0  ;;  %v665_v35 = vsel %vm662_vm11, %v663_v25, %v664_v29  ;;  %v369_v36 = vpack.c.b16 %v586_v27, %v546_v23  ;;  %v175_v38 = vmul.f32 255.0, %v143_v26  ;;  %v168_v18 = vld [vmem:[%s939_s24 + $0xe8] sm:$0xff]  ;;  %v153_v27 = vld [vmem:[%s939_s24 + $0x70] sm:$0xff] }
  0x43   : > { %v511_v37 = vclamp-gez-f32 %v190_v30, 255.0  ;;  %v666_v39 = vcvt.f32.s32 %v665_v35  ;;  %v519_v40 = vclamp-gez-f32 %v198_v32, 255.0  ;;  %vm547_vm12 = vcmp.lt.s32.totalorder %v495_v33, 0 }
  0x44   : > { %v548_v41 = vceil.f32 %v495_v33  ;;  %v549_v42 = vfloor.f32 %v495_v33  ;;  %vm587_vm13 = vcmp.lt.s32.totalorder %v503_v34, 0  ;;  %v588_v43 = vceil.f32 %v503_v34 }
  0x45   : > { %v589_v44 = vfloor.f32 %v503_v34  ;;  %v370_v45 = vpack.c.b16 %v666_v39, %v626_v31  ;;  %vm627_vm14 = vcmp.lt.s32.totalorder %v511_v37, 0  ;;  %v628_v46 = vceil.f32 %v511_v37 }
  0x46   : > { %v629_v47 = vfloor.f32 %v511_v37  ;;  %v550_v50 = vsel %vm547_vm12, %v548_v41, %v549_v42  ;;  %vm667_vm15 = vcmp.lt.s32.totalorder %v519_v40, 0  ;;  %v668_v52 = vceil.f32 %v519_v40 }
  0x47   : > { %v590_v51 = vsel %vm587_vm13, %v588_v43, %v589_v44  ;;  %v371_v55 = vpack.c.b8 %v370_v45, %v369_v36  ;;  %v551_v56 = vcvt.f32.s32 %v550_v50  ;;  %v669_v61 = vfloor.f32 %v519_v40  ;;  %v169_v50 = vld [vmem:[%s939_s24 + $0xf0] sm:$0xff] }
  0x48   : > { %v591_v57 = vcvt.f32.s32 %v590_v51  ;;  %v630_v58 = vsel %vm627_vm14, %v628_v46, %v629_v47  ;;  %v183_v62 = vmul.f32 255.0, %v151_v48  ;;  %v191_v63 = vmul.f32 255.0, %v159_v49  ;;  %v161_v49 = vld [vmem:[%s939_s24 + $0xb0] sm:$0xff] }
  0x49   : > { %v631_v60 = vcvt.f32.s32 %v630_v58  ;;  %389 = vst [vmem:[%s962_s25 + $0x10] sm:$0xff] %v371_v55  ;;  %v199_v1 = vmul.f32 255.0, %v167_v53  ;;  %v496_v2 = vclamp-gez-f32 %v175_v38, 255.0  ;;  %v176_v3 = vmul.f32 255.0, %v144_v54  ;;  %v146_v54 = vld [vmem:[%s939_s24 + $0x38] sm:$0xff] }
  0x4a   : > { %v372_v0 = vpack.c.b16 %v591_v57, %v551_v56  ;;  %v670_v4 = vsel %vm667_vm15, %v668_v52, %v669_v61  ;;  %v504_v5 = vclamp-gez-f32 %v183_v62, 255.0  ;;  %v512_v6 = vclamp-gez-f32 %v191_v63, 255.0 }
  0x4b   : > { %v184_v7 = vmul.f32 255.0, %v152_v59  ;;  %v671_v8 = vcvt.f32.s32 %v670_v4  ;;  %v520_v9 = vclamp-gez-f32 %v199_v1, 255.0  ;;  %vm552_vm0 = vcmp.lt.s32.totalorder %v496_v2, 0 }
  0x4c   : > { %v553_v10 = vceil.f32 %v496_v2  ;;  %v554_v11 = vfloor.f32 %v496_v2  ;;  %vm592_vm1 = vcmp.lt.s32.totalorder %v504_v5, 0  ;;  %v593_v12 = vceil.f32 %v504_v5 }
  0x4d   : > { %v594_v13 = vfloor.f32 %v504_v5  ;;  %v373_v14 = vpack.c.b16 %v671_v8, %v631_v60  ;;  %vm632_vm2 = vcmp.lt.s32.totalorder %v512_v6, 0  ;;  %v633_v15 = vceil.f32 %v512_v6 }
  0x4e   : > { %v634_v16 = vfloor.f32 %v512_v6  ;;  %v555_v19 = vsel %vm552_vm0, %v553_v10, %v554_v11  ;;  %vm672_vm3 = vcmp.lt.s32.totalorder %v520_v9, 0  ;;  %v673_v21 = vceil.f32 %v520_v9 }
  0x4f   : > { %v595_v20 = vsel %vm592_vm1, %v593_v12, %v594_v13  ;;  %v374_v23 = vpack.c.b8 %v373_v14, %v372_v0  ;;  %v556_v24 = vcvt.f32.s32 %v555_v19  ;;  %v674_v29 = vfloor.f32 %v520_v9  ;;  %v154_v12 = vld [vmem:[%s939_s24 + $0x78] sm:$0xff] }
  0x50   : > { %v596_v25 = vcvt.f32.s32 %v595_v20  ;;  %v635_v26 = vsel %vm632_vm2, %v633_v15, %v634_v16  ;;  %v192_v30 = vmul.f32 255.0, %v160_v17  ;;  %v200_v31 = vmul.f32 255.0, %v168_v18  ;;  %v162_v13 = vld [vmem:[%s939_s24 + $0xb8] sm:$0xff] }
  0x51   : > { %v636_v28 = vcvt.f32.s32 %v635_v26  ;;  %390 = vst [vmem:[%s962_s25 + $0x18] sm:$0xff] %v374_v23  ;;  %v497_v33 = vclamp-gez-f32 %v176_v3, 255.0  ;;  %v505_v34 = vclamp-gez-f32 %v184_v7, 255.0  ;;  %v177_v35 = vmul.f32 255.0, %v145_v22  ;;  %v170_v17 = vld [vmem:[%s939_s24 + $0xf8] sm:$0xff] }
  0x52   : > { %v375_v32 = vpack.c.b16 %v596_v25, %v556_v24  ;;  %v675_v36 = vsel %vm672_vm3, %v673_v21, %v674_v29  ;;  %v513_v37 = vclamp-gez-f32 %v192_v30, 255.0  ;;  %v521_v38 = vclamp-gez-f32 %v200_v31, 255.0 }
  0x53   : > { %v185_v39 = vmul.f32 255.0, %v153_v27  ;;  %v676_v40 = vcvt.f32.s32 %v675_v36  ;;  %vm557_vm4 = vcmp.lt.s32.totalorder %v497_v33, 0  ;;  %v558_v41 = vceil.f32 %v497_v33 }
  0x54   : > { %v559_v42 = vfloor.f32 %v497_v33  ;;  %vm597_vm5 = vcmp.lt.s32.totalorder %v505_v34, 0  ;;  %v598_v43 = vceil.f32 %v505_v34  ;;  %v599_v44 = vfloor.f32 %v505_v34 }
  0x55   : > { %vm637_vm6 = vcmp.lt.s32.totalorder %v513_v37, 0  ;;  %v376_v45 = vpack.c.b16 %v676_v40, %v636_v28  ;;  %v638_v47 = vceil.f32 %v513_v37  ;;  %v639_v48 = vfloor.f32 %v513_v37 }
  0x56   : > { %v560_v46 = vsel %vm557_vm4, %v558_v41, %v559_v42  ;;  %v600_v52 = vsel %vm597_vm5, %v598_v43, %v599_v44  ;;  %vm677_vm7 = vcmp.lt.s32.totalorder %v521_v38, 0  ;;  %v678_v53 = vceil.f32 %v521_v38 }
  0x57   : > { %v561_v51 = vcvt.f32.s32 %v560_v46  ;;  %v377_v55 = vpack.c.b8 %v376_v45, %v375_v32  ;;  %v601_v56 = vcvt.f32.s32 %v600_v52  ;;  %v640_v57 = vsel %vm637_vm6, %v638_v47, %v639_v48 }
  0x58   : > { %v679_v58 = vfloor.f32 %v521_v38  ;;  %v641_v59 = vcvt.f32.s32 %v640_v57  ;;  %v193_v60 = vmul.f32 255.0, %v161_v49  ;;  %v201_v61 = vmul.f32 255.0, %v169_v50 }
  0x59   : > { %v498_v62 = vclamp-gez-f32 %v177_v35, 255.0  ;;  %391 = vst [vmem:[%s962_s25 + $0x20] sm:$0xff] %v377_v55  ;;  %v378_v0 = vpack.c.b16 %v601_v56, %v561_v51  ;;  %v506_v1 = vclamp-gez-f32 %v185_v39, 255.0  ;;  %v178_v2 = vmul.f32 255.0, %v146_v54 }
  0x5a   : > { %v680_v63 = vsel %vm677_vm7, %v678_v53, %v679_v58  ;;  %v514_v4 = vclamp-gez-f32 %v193_v60, 255.0  ;;  %v522_v5 = vclamp-gez-f32 %v201_v61, 255.0  ;;  %v186_v24 = vmul.f32 255.0, %v154_v12 }
  0x5b   : > { %v681_v3 = vcvt.f32.s32 %v680_v63  ;;  %vm562_vm8 = vcmp.lt.s32.totalorder %v498_v62, 0  ;;  %v563_v6 = vceil.f32 %v498_v62  ;;  %v564_v7 = vfloor.f32 %v498_v62 }
  0x5c   : > { %vm602_vm9 = vcmp.lt.s32.totalorder %v506_v1, 0  ;;  %v603_v8 = vceil.f32 %v506_v1  ;;  %v604_v10 = vfloor.f32 %v506_v1  ;;  %vm642_vm10 = vcmp.lt.s32.totalorder %v514_v4, 0 }
  0x5d   : > { %v379_v9 = vpack.c.b16 %v681_v3, %v641_v59  ;;  %v643_v11 = vceil.f32 %v514_v4  ;;  %v565_v14 = vsel %vm562_vm8, %v563_v6, %v564_v7  ;;  %v644_v15 = vfloor.f32 %v514_v4 }
  0x5e   : > { %vm682_vm11 = vcmp.lt.s32.totalorder %v522_v5, 0  ;;  %v683_v16 = vceil.f32 %v522_v5  ;;  %v566_v19 = vcvt.f32.s32 %v565_v14  ;;  %v605_v20 = vsel %vm602_vm9, %v603_v8, %v604_v10 }
  0x5f   : > { %v380_v18 = vpack.c.b8 %v379_v9, %v378_v0  ;;  %v684_v21 = vfloor.f32 %v522_v5  ;;  %v606_v22 = vcvt.f32.s32 %v605_v20  ;;  %v645_v23 = vsel %vm642_vm10, %v643_v11, %v644_v15 }
  0x60   : > { %v194_v25 = vmul.f32 255.0, %v162_v13  ;;  %v646_v26 = vcvt.f32.s32 %v645_v23  ;;  %v202_v28 = vmul.f32 255.0, %v170_v17  ;;  %v499_v29 = vclamp-gez-f32 %v178_v2, 255.0 }
  0x61   : > { %392 = vst [vmem:[%s962_s25 + $0x28] sm:$0xff] %v380_v18  ;;  %v685_v27 = vsel %vm682_vm11, %v683_v16, %v684_v21  ;;  %v381_v31 = vpack.c.b16 %v606_v22, %v566_v19  ;;  %v507_v32 = vclamp-gez-f32 %v186_v24, 255.0 }
  0x62   : > { %v686_v30 = vcvt.f32.s32 %v685_v27  ;;  %v515_v33 = vclamp-gez-f32 %v194_v25, 255.0  ;;  %v523_v34 = vclamp-gez-f32 %v202_v28, 255.0  ;;  %vm567_vm12 = vcmp.lt.s32.totalorder %v499_v29, 0 }
  0x63   : > { %v568_v35 = vceil.f32 %v499_v29  ;;  %v569_v36 = vfloor.f32 %v499_v29  ;;  %vm607_vm13 = vcmp.lt.s32.totalorder %v507_v32, 0  ;;  %v608_v38 = vceil.f32 %v507_v32 }
  0x64   : > { %v382_v37 = vpack.c.b16 %v686_v30, %v646_v26  ;;  %v609_v39 = vfloor.f32 %v507_v32  ;;  %vm647_vm14 = vcmp.lt.s32.totalorder %v515_v33, 0  ;;  %v648_v41 = vceil.f32 %v515_v33 }
  0x65   : > { %v570_v40 = vsel %vm567_vm12, %v568_v35, %v569_v36  ;;  %v649_v42 = vfloor.f32 %v515_v33  ;;  %vm687_vm15 = vcmp.lt.s32.totalorder %v523_v34, 0  ;;  %v688_v48 = vceil.f32 %v523_v34 }
  0x66   : > { %v383_v43 = vpack.c.b8 %v382_v37, %v381_v31  ;;  %v571_v44 = vcvt.f32.s32 %v570_v40  ;;  %v610_v45 = vsel %vm607_vm13, %v608_v38, %v609_v39  ;;  %v689_v49 = vfloor.f32 %v523_v34 }
  0x67   : > { %v611_v46 = vcvt.f32.s32 %v610_v45  ;;  %v650_v47 = vsel %vm647_vm14, %v648_v41, %v649_v42 }
  0x68   : > { %393 = vst [vmem:[%s962_s25 + $0x30] sm:$0xff] %v383_v43  ;;  %v651_v50 = vcvt.f32.s32 %v650_v47  ;;  %v690_v51 = vsel %vm687_vm15, %v688_v48, %v689_v49 }
  0x69   : > { %v691_v52 = vcvt.f32.s32 %v690_v51  ;;  %v384_v53 = vpack.c.b16 %v611_v46, %v571_v44 }
  0x6b   : > { %v385_v54 = vpack.c.b16 %v691_v52, %v651_v50 }
  0x6d   : > { %v386_v55 = vpack.c.b8 %v385_v54, %v384_v53 }
  0x6f   : > { %394 = vst [vmem:[%s962_s25 + $0x38] sm:$0xff] %v386_v55 }
  0x70   : > { %797 = shalt.err (!%p794_p4)
}
  0x71   : > { %694 = dma.vmem_to_hbm [thread:$0]  (%p899_p10), %s410_s10, 1024, %s412_s30, %s396_s2  }
  0x72 PF: > { %p705_p5 = scmp.ge.s32.totalorder %s836_s9, 2  ;;  %s423_s20 = sand.u32 1, %s824_s6  }
  0x73   : > { %s424_s21 = scalar_lea.sflag [#allocation4], %s423_s20 }
  0x74   : > { %p701_p7 = pnand %p705_p5, %p903_p11 }
  0x76   : > { %p702_p8 = pneg %p701_p7 }
  0x78   : > { %819 = dma.done.wait (%p702_p8), %s424_s21, 1024  }
  0x79   : > { %821 = vsyncadd (%p702_p8), %s424_s21, 4294966272  ;;  %p14_p9 = scmp.ge.s32.totalorder %s875_s12, 5   ;;  %s1032_s6 = smov %s828_s7 }
  0x7a   : > { %s1033_s7 = smov %s832_s8  ;;  %s1034_s8 = smov %s887_s15 }
  0x7b   : > { %s1035_s9 = smov %s875_s12  ;;  %16 = sbr.rel (!%p14_p9) target bundleno = 5 (0x5), region = 69 }
  0x80   :  { %430 = vsyncpa [#allocation3], 1 }
  0x81   :  { %432 = vsyncpa [#allocation3 + $0x1], 1 }
  0x82   :  { %433 = vsyncpa [#allocation4], 1 }
  0x83   :  { %435 = vsyncpa [#allocation4 + $0x1], 1 }

</bundles_post_ra>
